<compile_context>
chip_gen: v5e
topology: v5e:2x2
jax: 0.10.0
libtpu: 0.0.40
codegen_flags: <defaults>
</compile_context>

<pallas_src>
import functools
import math

import jax
import jax.numpy as jnp
from jax.experimental import pallas as pl
from jax.experimental.pallas import tpu as pltpu

_NEG_INF = -1e30
_MIB = 1024 * 1024


def _round_up(a: int, b: int) -> int:
    return (a + b - 1) // b * b


def _clamp_vmem(nbytes: int) -> int:
    # nbytes already includes double-buffering; add ~25% headroom and cap at a
    # value safe on every generation (v7x physical VMEM is only 64 MiB).
    return int(min(48 * _MIB, max(int(1.25 * nbytes), 4 * _MIB)))


# ----------------------------------------------------------------------------
# Linear family: y = x @ W.T (+ residual), optionally x := silu(a) * g
# ----------------------------------------------------------------------------
def _make_linear_kernel(has_gate: bool, has_residual: bool, compute_dtype):
    def kernel(*refs):
        acc_ref = refs[-1]
        o_ref = refs[-2]
        it = iter(refs[:-2])
        x_ref = next(it)
        g_ref = next(it) if has_gate else None
        w_ref = next(it)
        r_ref = next(it) if has_residual else None

        k = pl.program_id(2)

        @pl.when(k == 0)
        def _():
            acc_ref[...] = jnp.zeros_like(acc_ref)

        if has_gate:
            a = x_ref[...].astype(jnp.float32)
            g = g_ref[...].astype(jnp.float32)
            xin = (a / (1.0 + jnp.exp(-a)) * g).astype(compute_dtype)
        else:
            xin = x_ref[...].astype(compute_dtype)

        # x tile (tm, tk), w tile (tn, tk): contract trailing K axes on the MXU
        # directly (no in-kernel transpose), bf16 operands, f32 accumulation.
        acc_ref[...] += jax.lax.dot_general(
            xin, w_ref[...].astype(compute_dtype),
            dimension_numbers=(((1,), (1,)), ((), ())),
            preferred_element_type=jnp.float32,
        )

        @pl.when(k == pl.num_programs(2) - 1)
        def _():
            out = acc_ref[...]
            if has_residual:
                out = out + r_ref[...].astype(jnp.float32)
            o_ref[...] = out.astype(o_ref.dtype)

    return kernel


def linear_forward(x: jax.Array, weight: jax.Array, *, gate: jax.Array | None = None,
                   residual: jax.Array | None = None, tm: int = 512, tn: int = 512,
                   tk: int = 512, compute_dtype=jnp.bfloat16, out_dtype=None) -> jax.Array:
    """y = x @ weight.T (weight: (d_out, d_in)); if gate is given, x := silu(x)*gate;
    if residual is given, it is added in the final-k epilogue."""
    d_out, d_in = weight.shape
    orig_shape = x.shape
    assert orig_shape[-1] == d_in
    out_dtype = x.dtype if out_dtype is None else out_dtype

    m = math.prod(orig_shape[:-1])
    x2d = x.reshape(m, d_in)

    # Clamp tiles to (padded) problem size; keep sublane/lane alignment.
    tm = min(tm, _round_up(m, 8))
    tn = min(tn, _round_up(d_out, 128))    # lane-dense output tiles
    tk = min(tk, _round_up(d_in, 128))

    mp = _round_up(m, tm)
    np_ = _round_up(d_out, tn)
    kp = _round_up(d_in, tk)

    def pad2(t, rows, cols):
        r, c = t.shape
        if (rows, cols) != (r, c):
            t = jnp.pad(t, ((0, rows - r), (0, cols - c)))
        return t

    x2d = pad2(x2d, mp, kp)
    w = pad2(weight, np_, kp)

    inputs = [x2d]
    in_specs = [pl.BlockSpec((tm, tk), lambda i, j, k: (i, k))]
    if gate is not None:
        assert gate.shape == orig_shape
        inputs.append(pad2(gate.reshape(m, d_in), mp, kp))
        in_specs.append(pl.BlockSpec((tm, tk), lambda i, j, k: (i, k)))
    inputs.append(w)
    in_specs.append(pl.BlockSpec((tn, tk), lambda i, j, k: (j, k)))
    if residual is not None:
        assert residual.shape[:-1] == orig_shape[:-1] and residual.shape[-1] == d_out
        inputs.append(pad2(residual.reshape(m, d_out), mp, np_))
        in_specs.append(pl.BlockSpec((tm, tn), lambda i, j, k: (i, j)))

    grid = (mp // tm, np_ // tn, kp // tk)

    x_isz = jnp.dtype(x2d.dtype).itemsize
    w_isz = jnp.dtype(w.dtype).itemsize
    o_isz = jnp.dtype(out_dtype).itemsize
    r_isz = jnp.dtype(residual.dtype).itemsize if residual is not None else 0
    n_x = 2 if gate is not None else 1
    # double-buffered x/(gate)/w/out/(residual) tiles + resident f32 accumulator
    tile_bytes = (2 * n_x * tm * tk * x_isz + 2 * tn * tk * w_isz
                  + 2 * tm * tn * o_isz + 2 * tm * tn * r_isz + tm * tn * 4)
    vmem_limit = _clamp_vmem(tile_bytes)

    bytes_accessed = (n_x * mp * kp * x_isz + np_ * kp * w_isz
                      + mp * np_ * o_isz + mp * np_ * r_isz)

    kernel = _make_linear_kernel(gate is not None, residual is not None, compute_dtype)

    out = pl.pallas_call(
        kernel,
        out_shape=jax.ShapeDtypeStruct((mp, np_), out_dtype),
        grid_spec=pltpu.PrefetchScalarGridSpec(
            num_scalar_prefetch=0,
            grid=grid,
            in_specs=in_specs,
            out_specs=pl.BlockSpec((tm, tn), lambda i, j, k: (i, j)),
            scratch_shapes=[pltpu.VMEM((tm, tn), jnp.float32)],
        ),
        compiler_params=pltpu.CompilerParams(
            dimension_semantics=("parallel", "parallel", "arbitrary"),
            vmem_limit_bytes=vmem_limit,
        ),
        cost_estimate=pl.CostEstimate(
            flops=2 * mp * np_ * kp,
            transcendentals=(mp * kp if gate is not None else 0),
            bytes_accessed=bytes_accessed,
        ),
    )(*inputs)

    if (mp, np_) != (m, d_out):
        out = out[:m, :d_out]
    return out.reshape(*orig_shape[:-1], d_out)


# ----------------------------------------------------------------------------
# RMSNorm
# ----------------------------------------------------------------------------
def _rmsnorm_kernel(x_ref, w_ref, o_ref, *, eps):
    x = x_ref[...].astype(jnp.float32)
    ms = jnp.mean(x * x, axis=-1, keepdims=True)
    inv = jax.lax.rsqrt(ms + eps)
    o_ref[...] = (x * inv * w_ref[...].astype(jnp.float32)).astype(o_ref.dtype)


def rmsnorm_forward(x: jax.Array, weight: jax.Array, eps: float = 1e-5,
                    *, tm: int = 256, out_dtype=None) -> jax.Array:
    out_dtype = x.dtype if out_dtype is None else out_dtype
    orig_shape = x.shape
    d = orig_shape[-1]
    m = math.prod(orig_shape[:-1])
    x2d = x.reshape(m, d)

    # VMEM-safe row tile: keep double-buffered in+out tiles around ~8 MiB.
    row_bytes = d * (jnp.dtype(x.dtype).itemsize + jnp.dtype(out_dtype).itemsize)
    fit = max(8, (8 * _MIB // max(2 * row_bytes, 1)) // 8 * 8)
    tm = min(tm, fit, _round_up(m, 8))
    mp = _round_up(m, tm)
    if mp != m:
        x2d = jnp.pad(x2d, ((0, mp - m), (0, 0)))
    w2d = weight.reshape(1, d)

    tile_bytes = (2 * tm * d * jnp.dtype(x.dtype).itemsize
                  + 2 * tm * d * jnp.dtype(out_dtype).itemsize
                  + 2 * d * jnp.dtype(weight.dtype).itemsize)

    out = pl.pallas_call(
        functools.partial(_rmsnorm_kernel, eps=eps),
        out_shape=jax.ShapeDtypeStruct((mp, d), out_dtype),
        grid_spec=pltpu.PrefetchScalarGridSpec(
            num_scalar_prefetch=0,
            grid=(mp // tm,),
            in_specs=[
                pl.BlockSpec((tm, d), lambda i: (i, 0)),
                pl.BlockSpec((1, d), lambda i: (0, 0)),
            ],
            out_specs=pl.BlockSpec((tm, d), lambda i: (i, 0)),
        ),
        compiler_params=pltpu.CompilerParams(
            dimension_semantics=("parallel",),
            vmem_limit_bytes=_clamp_vmem(tile_bytes),
        ),
    )(x2d, w2d)

    if mp != m:
        out = out[:m]
    return out.reshape(orig_shape)


# ----------------------------------------------------------------------------
# Causal flash attention: q, k, v are (B*H, S, Dk)
# ----------------------------------------------------------------------------
def _attn_kernel(q_ref, k_ref, v_ref, o_ref, m_sc, l_sc, acc_sc, *,
                 scale, blk, compute_dtype):
    qi = pl.program_id(1)
    ki = pl.program_id(2)

    @pl.when(ki == 0)
    def _():
        m_sc[...] = jnp.full(m_sc.shape, _NEG_INF, dtype=jnp.float32)
        l_sc[...] = jnp.zeros(l_sc.shape, dtype=jnp.float32)
        acc_sc[...] = jnp.zeros(acc_sc.shape, dtype=jnp.float32)

    # Fully-masked (future) kv tiles contribute nothing: skip their compute.
    @pl.when(ki <= qi)
    def _():
        # Fold 1/sqrt(dk) into the (blk, Dk) q tile (cheaper than scaling the
        # (blk, blk) score tile every kv step), then run the dots in bf16.
        q = (q_ref[0].astype(jnp.float32) * scale).astype(compute_dtype)
        kt = k_ref[0].astype(compute_dtype)
        s = jax.lax.dot_general(
            q, kt, dimension_numbers=(((1,), (1,)), ((), ())),
            preferred_element_type=jnp.float32,
        )                                                       # (blk, blk)

        q_pos = qi * blk + jax.lax.broadcasted_iota(jnp.int32, s.shape, 0)
        k_pos = ki * blk + jax.lax.broadcasted_iota(jnp.int32, s.shape, 1)
        s = jnp.where(k_pos <= q_pos, s, _NEG_INF)

        m_prev = m_sc[...]
        m_new = jnp.maximum(m_prev, jnp.max(s, axis=-1, keepdims=True))
        alpha = jnp.exp(m_prev - m_new)
        p = jnp.exp(s - m_new)

        l_sc[...] = alpha * l_sc[...] + jnp.sum(p, axis=-1, keepdims=True)
        acc_sc[...] = alpha * acc_sc[...] + jax.lax.dot_general(
            p.astype(compute_dtype), v_ref[0].astype(compute_dtype),
            dimension_numbers=(((1,), (0,)), ((), ())),
            preferred_element_type=jnp.float32,
        )
        m_sc[...] = m_new

    @pl.when(ki == pl.num_programs(2) - 1)
    def _():
        o_ref[0] = (acc_sc[...] * pl.reciprocal(l_sc[...], approx=True)).astype(o_ref.dtype)


def mha_forward(q: jax.Array, k: jax.Array, v: jax.Array, *, blk: int = 256,
                compute_dtype=jnp.bfloat16) -> jax.Array:
    """Causal attention over (B*H, S, Dk) inputs."""
    bh, s, dk = q.shape
    scale = 1.0 / math.sqrt(dk)

    blk = min(blk, _round_up(s, 8))
    sp = _round_up(s, blk)
    if sp != s:
        pad = ((0, 0), (0, sp - s), (0, 0))
        q = jnp.pad(q, pad)
        k = jnp.pad(k, pad)
        v = jnp.pad(v, pad)

    n_blk = sp // blk
    grid = (bh, n_blk, n_blk)
    kernel = functools.partial(_attn_kernel, scale=scale, blk=blk,
                               compute_dtype=compute_dtype)

    # Clamp the K/V block index to the causal frontier so future (fully-masked)
    # kv tiles are never DMA'd: the already-resident block is reused instead.
    def kv_map(b, qi, ki):
        return (b, jnp.minimum(qi, ki), 0)

    out = pl.pallas_call(
        kernel,
        out_shape=jax.ShapeDtypeStruct((bh, sp, dk), q.dtype),
        grid_spec=pltpu.PrefetchScalarGridSpec(
            num_scalar_prefetch=0,
            grid=grid,
            in_specs=[
                pl.BlockSpec((1, blk, dk), lambda b, qi, ki: (b, qi, 0)),
                pl.BlockSpec((1, blk, dk), kv_map),
                pl.BlockSpec((1, blk, dk), kv_map),
            ],
            out_specs=pl.BlockSpec((1, blk, dk), lambda b, qi, ki: (b, qi, 0)),
            scratch_shapes=[
                pltpu.VMEM((blk, 1), jnp.float32),
                pltpu.VMEM((blk, 1), jnp.float32),
                pltpu.VMEM((blk, dk), jnp.float32),
            ],
        ),
        compiler_params=pltpu.CompilerParams(
            dimension_semantics=("parallel", "parallel", "arbitrary")),
    )(q, k, v)

    if sp != s:
        out = out[:, :s, :]
    return out


# ----------------------------------------------------------------------------
# RoPE (plain JAX glue) and full Block forward
# ----------------------------------------------------------------------------
def rope_cache(theta: float, d_k: int, max_seq_len: int):
    positions = jnp.arange(max_seq_len, dtype=jnp.float32)
    ang_freq = 1.0 / theta ** (jnp.arange(0, d_k, 2, dtype=jnp.float32) / d_k)
    angles = positions[:, None] * ang_freq[None, :]
    return jnp.cos(angles), jnp.sin(angles)


def apply_rope(x: jax.Array, cos: jax.Array, sin: jax.Array) -> jax.Array:
    # x: (..., S, Dk); cos/sin: (S, Dk//2) — interleaved even/odd rotation (torch layout).
    xf = x.astype(jnp.float32)
    x_even = xf[..., 0::2]
    x_odd = xf[..., 1::2]
    r_even = x_even * cos - x_odd * sin
    r_odd = x_even * sin + x_odd * cos
    return jnp.stack([r_even, r_odd], axis=-1).reshape(x.shape).astype(x.dtype)


def block_forward(x, params, *, num_heads, cos_cache, sin_cache, eps=1e-5,
                  compute_dtype=jnp.bfloat16, attn_blk=256,
                  gemm_tiles=(512, 512, 512)):
    b, s, d = x.shape
    h = num_heads
    dk = d // h
    dff = params["w1"].shape[0]
    cos, sin = cos_cache[:s], sin_cache[:s]
    tm, tn, tk = gemm_tiles
    cdt = compute_dtype

    # "Store" weights in bf16 and fuse Q/K/V and W1/W3 into single GEMM weights.
    qkv_w = jnp.concatenate([params["q_w"], params["k_w"], params["v_w"]], axis=0).astype(cdt)
    o_w = params["o_w"].astype(cdt)
    w13 = jnp.concatenate([params["w1"], params["w3"]], axis=0).astype(cdt)
    w2 = params["w2"].astype(cdt)

    # --- attention sub-block ---
    hn = rmsnorm_forward(x, params["ln1_w"], eps=eps, out_dtype=cdt)
    qkv = linear_forward(hn, qkv_w, tm=tm, tn=tn, tk=tk,
                         compute_dtype=cdt, out_dtype=cdt)
    q, k, v = qkv[..., :d], qkv[..., d:2 * d], qkv[..., 2 * d:]

    def split_heads(t):
        return t.reshape(b, s, h, dk).transpose(0, 2, 1, 3).reshape(b * h, s, dk)

    # TODO(synk): RoPE (interleaved even/odd rotation) and the head split/merge
    # transposes remain XLA layout glue rather than being fused into the
    # attention kernel's load path.
    qh = apply_rope(split_heads(q), cos, sin)
    kh = apply_rope(split_heads(k), cos, sin)
    vh = split_heads(v)

    attn = mha_forward(qh, kh, vh, blk=attn_blk, compute_dtype=cdt)
    attn = attn.reshape(b, h, s, dk).transpose(0, 2, 1, 3).reshape(b, s, d)
    # residual add fused into the o_proj GEMM epilogue
    y = linear_forward(attn, o_w, residual=x, tm=tm, tn=tn, tk=tk,
                       compute_dtype=cdt, out_dtype=x.dtype)

    # --- feed-forward sub-block ---
    hn2 = rmsnorm_forward(y, params["ln2_w"], eps=eps, out_dtype=cdt)
    ag = linear_forward(hn2, w13, tm=tm, tn=tn, tk=tk,
                        compute_dtype=cdt, out_dtype=cdt)
    a, g = ag[..., :dff], ag[..., dff:]
    # silu(a)*g gate + residual add fused into the w2 GEMM
    return linear_forward(a, w2, gate=g, residual=y, tm=tm, tn=tn, tk=tk,
                          compute_dtype=cdt, out_dtype=x.dtype)


# ----------------------------------------------------------------------------
# Pure-JAX reference (for correctness check) and init
# ----------------------------------------------------------------------------
def block_reference(x, params, *, num_heads, cos_cache, sin_cache, eps=1e-5):
    hi = jax.lax.Precision.HIGHEST

    def rmsnorm(t, w):
        tf = t.astype(jnp.float32)
        inv = jax.lax.rsqrt(jnp.mean(tf * tf, axis=-1, keepdims=True) + eps)
        return (tf * inv * w).astype(t.dtype)

    def linear(t, w):
        return jnp.einsum("oi,...i->...o", w, t, precision=hi)

    b, s, d = x.shape
    h = num_heads
    dk = d // h
    cos, sin = cos_cache[:s], sin_cache[:s]

    hn = rmsnorm(x, params["ln1_w"])
    q, k, v = linear(hn, params["q_w"]), linear(hn, params["k_w"]), linear(hn, params["v_w"])

    def split(t):
        return t.reshape(b, s, h, dk).transpose(0, 2, 1, 3)

    qh, kh, vh = split(q), split(k), split(v)
    qh, kh = apply_rope(qh, cos, sin), apply_rope(kh, cos, sin)

    scores = jnp.einsum("bhqd,bhkd->bhqk", qh, kh, precision=hi) / math.sqrt(dk)
    mask = jnp.tril(jnp.ones((s, s), dtype=bool))
    scores = jnp.where(mask, scores, -jnp.inf)
    attn = jax.nn.softmax(scores, axis=-1)
    o = jnp.einsum("bhqk,bhkd->bhqd", attn, vh, precision=hi)
    o = o.transpose(0, 2, 1, 3).reshape(b, s, d)
    y = x + linear(o, params["o_w"])

    hn2 = rmsnorm(y, params["ln2_w"])
    a = linear(hn2, params["w1"])
    g = linear(hn2, params["w3"])
    ffn = linear(a * jax.nn.sigmoid(a) * g, params["w2"])
    return y + ffn


def init_linear_weight(key, in_features: int, out_features: int, dtype=jnp.float32):
    std = math.sqrt(2.0 / (in_features + out_features))
    w = jax.random.truncated_normal(
        key, lower=-3.0, upper=3.0, shape=(out_features, in_features), dtype=jnp.float32
    ) * std
    return w.astype(dtype)


if __name__ == "__main__":
    key = jax.random.PRNGKey(0)
    keys = jax.random.split(key, 8)

    # Small shapes that still exercise multi-tile grids, K-reduction loops,
    # the causal kv-tile skip and the clamped K/V index maps.
    B, S, D, H, DFF = 2, 64, 128, 4, 256
    MAX_SEQ, THETA, EPS = 128, 10000.0, 1e-5

    params = {
        "ln1_w": jnp.ones((D,), jnp.float32),
        "ln2_w": jnp.ones((D,), jnp.float32),
        "q_w": init_linear_weight(keys[0], D, D),
        "k_w": init_linear_weight(keys[1], D, D),
        "v_w": init_linear_weight(keys[2], D, D),
        "o_w": init_linear_weight(keys[3], D, D),
        "w1": init_linear_weight(keys[4], D, DFF),
        "w2": init_linear_weight(keys[5], DFF, D),
        "w3": init_linear_weight(keys[6], D, DFF),
    }
    x = jax.random.normal(keys[7], (B, S, D), dtype=jnp.float32)

    cos_cache, sin_cache = rope_cache(THETA, D // H, MAX_SEQ)

    y = block_forward(x, params, num_heads=H, cos_cache=cos_cache,
                      sin_cache=sin_cache, eps=EPS,
                      attn_blk=16, gemm_tiles=(32, 128, 128))
    jax.block_until_ready(y)

    y_ref = block_reference(x, params, num_heads=H, cos_cache=cos_cache,
                            sin_cache=sin_cache, eps=EPS)
    assert y.shape == (B, S, D)
    err = float(jnp.max(jnp.abs(y - y_ref)))
    # bf16 MXU operands (f32 accumulation) vs f32-HIGHEST reference.
    assert jnp.allclose(y, y_ref, atol=3e-2, rtol=3e-2), err

    print("KERNEL_OK")
</pallas_src>

<mosaic_0001>
module attributes {stable_mosaic.version = 11 : i64} {
  func.func @_rmsnorm_kernel(%arg0: i32, %arg1: memref<128x128xf32, #tpu.memory_space<vmem>>, %arg2: memref<1x128xf32, #tpu.memory_space<vmem>>, %arg3: memref<128x128xbf16, #tpu.memory_space<vmem>>) attributes {dimension_semantics = [#tpu.dimension_semantics<parallel>], iteration_bounds = array<i64: 1>, scalar_prefetch = 0 : i64, scratch_operands = 0 : i64, tpu.core_type = #tpu.core_type<tc>, window_params = [{transform_indices = @transform_0, window_bounds = array<i64: 128, 128>}, {pipeline_mode = #tpu.pipeline_mode<synchronous>, transform_indices = @transform_1, window_bounds = array<i64: 1, 128>}, {transform_indices = @transform_2, window_bounds = array<i64: 128, 128>}]} {
    %c0 = arith.constant 0 : index
    %c0_0 = arith.constant 0 : index
    %0 = vector.load %arg1[%c0, %c0_0] : memref<128x128xf32, #tpu.memory_space<vmem>>, vector<128x128xf32>
    %1 = arith.mulf %0, %0 : vector<128x128xf32>
    %cst = arith.constant dense<0.000000e+00> : vector<128xf32>
    %2 = vector.multi_reduction <add>, %1, %cst [1] : vector<128x128xf32> to vector<128xf32>
    %3 = vector.shape_cast %2 : vector<128xf32> to vector<128x1xf32>
    %cst_1 = arith.constant 1.280000e+02 : f32
    %4 = vector.broadcast %cst_1 : f32 to vector<128x1xf32>
    %5 = arith.divf %3, %4 : vector<128x1xf32>
    %cst_2 = arith.constant 9.99999974E-6 : f32
    %6 = vector.broadcast %cst_2 : f32 to vector<128x1xf32>
    %7 = arith.addf %5, %6 : vector<128x1xf32>
    %8 = math.rsqrt %7 : vector<128x1xf32>
    %9 = vector.broadcast %8 : vector<128x1xf32> to vector<128x128xf32>
    %10 = arith.mulf %0, %9 : vector<128x128xf32>
    %c0_3 = arith.constant 0 : index
    %c0_4 = arith.constant 0 : index
    %11 = vector.load %arg2[%c0_3, %c0_4] : memref<1x128xf32, #tpu.memory_space<vmem>>, vector<1x128xf32>
    %12 = vector.broadcast %11 : vector<1x128xf32> to vector<128x128xf32>
    %13 = arith.mulf %10, %12 : vector<128x128xf32>
    %14 = arith.truncf %13 : vector<128x128xf32> to vector<128x128xbf16>
    %c0_5 = arith.constant 0 : index
    %c0_6 = arith.constant 0 : index
    %15 = vector.load %arg3[%c0_5, %c0_6] : memref<128x128xbf16, #tpu.memory_space<vmem>>, vector<128x128xbf16>
    tpu.vector_store %arg3[%c0_5, %c0_6], %14 {strides = array<i32>} : memref<128x128xbf16, #tpu.memory_space<vmem>>, vector<128x128xbf16>,
    return
  }
  func.func @transform_0(%arg0: i32) -> (i32, i32) {
    %c0_i32 = arith.constant 0 : i32
    %c0_i32_0 = arith.constant 0 : i32
    return %arg0, %c0_i32 : i32, i32
  }
  func.func @transform_1(%arg0: i32) -> (i32, i32) {
    %c0_i32 = arith.constant 0 : i32
    %c0_i32_0 = arith.constant 0 : i32
    %c0_i32_1 = arith.constant 0 : i32
    return %c0_i32, %c0_i32_0 : i32, i32
  }
  func.func @transform_2(%arg0: i32) -> (i32, i32) {
    %c0_i32 = arith.constant 0 : i32
    %c0_i32_0 = arith.constant 0 : i32
    return %arg0, %c0_i32 : i32, i32
  }
}

</mosaic_0001>

<bundles_post_ra>
// kernel: tpu_custom_call.1
= control target key start
LH: loop header
LB: loop body
LE: loop exit
PB: predicated region body
PF: predicated region fallthrough
CT: control target
= control target key end

     0   :  { %7 = vsyncpa [#allocation3], 0  ;;  %s903_s0 = inlined_call_operand.hbm [shape: f32[128,128], index: 0, kind: input, shape index: {}]   ;;  %s904_s1 = inlined_call_operand.hbm [shape: f32[1,128], index: 1, kind: input, shape index: {}]   ;;  %s905_s2 = inlined_call_operand.hbm [shape: bf16[128,128], index: 2, kind: output, shape index: {}]  }
   0x1   :  { %8 = vsyncpa [#allocation6], 0 }
   0x2   :  { %9 = vsyncpa [#allocation4], 0  ;;  %s14_s11 = sshll.u32 %s903_s0, 4  ;;  %s561_s12 = smov [#allocation2]   ;;  %s15_s11 = int_to_ptr.hbm [resolvable:$true] %s14_s11 }
   0x3   :  { %s16_s13 = sshll.u32 %s561_s12, 4  ;;  %s28_s16 = sshll.u32 %s904_s1, 4  ;;  %s17_s13 = int_to_ptr.vmem [resolvable:$true] %s16_s13  ;;  %s29_s16 = int_to_ptr.hbm [resolvable:$true] %s28_s16 }
   0x4   :  { %s562_s17 = smov 128   ;;  %s563_s18 = smov 8  }
   0x5   :  { %22 = dma.hbm_to_vmem [thread:$0]  %s15_s11, 2048, %s17_s13, [#allocation3], %s562_s17, %s562_s17, %s563_s18  }
   0x6   :  { %s564_s19 = smov [#allocation5]  }
   0x7   :  { %s30_s20 = sshll.u32 %s564_s19, 4  ;;  %s31_s20 = int_to_ptr.vmem [resolvable:$true] %s30_s20 }
   0x8   :  { %33 = dma.hbm_to_vmem [thread:$0]  %s29_s16, 16, %s31_s20, [#allocation6]  }
   0x9   :  { %555 = dma.done.wait [#allocation3], 2048  }
   0xa   :  { %556 = vsyncadd [#allocation3], 4294965248 }
   0xb   :  { %557 = dma.done.wait [#allocation6], 16  }
   0xc   :  { %558 = vsyncadd [#allocation6], 4294967280  ;;  %v590_v0 = vld [vmem:[#allocation2 + $0x20] sm:$0xff]  ;;  %v592_v1 = vld [vmem:[#allocation2 + $0x10] sm:$0xff]  ;;  %v565_v32 = vmov 128.0   ;;  %s566_s0 = smov [#allocation7]  }
   0xd   :  { %v594_v2 = vld [vmem:[#allocation2] sm:$0xff]  ;;  %v62_v3 = vmul.f32 %v590_v0, %v590_v0  ;;  %v60_v4 = vmul.f32 %v592_v1, %v592_v1  ;;  %v602_v6 = vld [vmem:[#allocation2 + $0x28] sm:$0xff]  ;;  %v604_v7 = vld [vmem:[#allocation2 + $0x18] sm:$0xff]  ;;  %449 = vrcp.f32 %v565_v32  ;;  %s377_s1 = sshll.u32 %s566_s0, 4  ;;  %s379_s23 = sshll.u32 %s905_s2, 4  ;;  %s378_s1 = int_to_ptr.vmem [resolvable:$true] %s377_s1  ;;  %s380_s23 = int_to_ptr.hbm [resolvable:$true] %s379_s23 }
   0xe   :  { %v58_v5 = vmul.f32 %v594_v2, %v594_v2  ;;  %v606_v8 = vld [vmem:[#allocation2 + $0x8] sm:$0xff]  ;;  %v63_v9 = vmul.f32 %v602_v6, %v602_v6  ;;  %v61_v10 = vmul.f32 %v604_v7, %v604_v7  ;;  %v614_v12 = vld [vmem:[#allocation2 + $0x40] sm:$0xff]  ;;  %v616_v13 = vld [vmem:[#allocation2 + $0x38] sm:$0xff]  ;;  %s567_s24 = smov 64   ;;  %s568_s25 = smov 4  }
   0xf   :  { %82 = vadd.xlane.f32.xlu2 %v62_v3  ;;  %78 = vadd.xlane.f32.xlu1 %v60_v4  ;;  %v59_v11 = vmul.f32 %v606_v8, %v606_v8  ;;  %v618_v14 = vld [vmem:[#allocation2 + $0x30] sm:$0xff]  ;;  %v66_v15 = vmul.f32 %v614_v12, %v614_v12  ;;  %v65_v16 = vmul.f32 %v616_v13, %v616_v13  ;;  %v626_v18 = vld [vmem:[#allocation2 + $0x58] sm:$0xff]  ;;  %v630_v20 = vld [vmem:[#allocation2 + $0x48] sm:$0xff] }
  0x10   :  { %74 = vadd.xlane.f32.xlu0 %v58_v5  ;;  %v64_v17 = vmul.f32 %v618_v14, %v618_v14  ;;  %v628_v19 = vld [vmem:[#allocation2 + $0x50] sm:$0xff]  ;;  %v69_v21 = vmul.f32 %v626_v18, %v626_v18  ;;  %v67_v23 = vmul.f32 %v630_v20, %v630_v20  ;;  %v640_v25 = vld [vmem:[#allocation2 + $0x68] sm:$0xff]  ;;  %v642_v26 = vld [vmem:[#allocation2 + $0x60] sm:$0xff] }
  0x11   :  { %v68_v22 = vmul.f32 %v628_v19, %v628_v19  ;;  %v638_v24 = vld [vmem:[#allocation2 + $0x70] sm:$0xff]  ;;  %v71_v28 = vmul.f32 %v640_v25, %v640_v25  ;;  %v70_v29 = vmul.f32 %v642_v26, %v642_v26  ;;  %v650_v30 = vld [vmem:[#allocation2 + $0x78] sm:$0xff] }
  0x12   :  { %v72_v27 = vmul.f32 %v638_v24, %v638_v24  ;;  %v73_v31 = vmul.f32 %v650_v30, %v650_v30 }
  0x13   :  { %v450_v33 = vpop.eup %449 }
  0x14   :  { %v107_v34 = vmul.f32 128.0, %v450_v33  ;;  %vm111_vm0 = vweird.f32 %v450_v33 }
  0x16   :  { %v108_v35 = vsub.f32 1.0, %v107_v34 }
  0x17   :  { %84 = vadd.xlane.f32.xlu2 %v63_v9  ;;  %80 = vadd.xlane.f32.xlu1 %v61_v10 }
  0x18   :  { %76 = vadd.xlane.f32.xlu0 %v59_v11  ;;  %v109_v36 = vmul.f32 %v450_v33, %v108_v35 }
  0x1a   :  { %v110_v37 = vadd.f32 %v450_v33, %v109_v36 }
  0x1c   :  { %v654_v38 = vsel %vm111_vm0, %v450_v33, %v110_v37 }
  0x1f   :  { %90 = vadd.xlane.f32.xlu2 %v66_v15  ;;  %88 = vadd.xlane.f32.xlu1 %v65_v16 }
  0x20   :  { %86 = vadd.xlane.f32.xlu0 %v64_v17 }
  0x27   :  { %96 = vadd.xlane.f32.xlu2 %v69_v21  ;;  %94 = vadd.xlane.f32.xlu1 %v68_v22 }
  0x28   :  { %92 = vadd.xlane.f32.xlu0 %v67_v23 }
  0x2f   :  { %102 = vadd.xlane.f32.xlu2 %v72_v27  ;;  %100 = vadd.xlane.f32.xlu1 %v71_v28 }
  0x30   :  { %98 = vadd.xlane.f32.xlu0 %v70_v29 }
  0x38   :  { %104 = vadd.xlane.f32.xlu0 %v73_v31 }
  0x82   :  { %v83_v39 = vpop.xlane.xlu2 %82  ;;  %v79_v40 = vpop.xlane.xlu1 %78 }
  0x83   :  { %v117_v41 = vmul.f32 %v654_v38, %v83_v39  ;;  %v115_v42 = vmul.f32 %v654_v38, %v79_v40  ;;  %v75_v43 = vpop.xlane.xlu0 %74 }
  0x84   :  { %v113_v44 = vmul.f32 %v654_v38, %v75_v43 }
  0x85   :  { %v133_v45 = vadd.f32 1e-05, %v117_v41  ;;  %v659_v46 = vadd.f32 1e-05, %v115_v42 }
  0x86   :  { %v661_v47 = vadd.f32 1e-05, %v113_v44 }
  0x87   :  { %451 = vrsqrt.f32 %v133_v45  ;;  %vm191_vm1 = vweird.f32 %v133_v45  ;;  %vm171_vm2 = vweird.f32 %v659_v46 }
  0x88   :  { %453 = vrsqrt.f32 %v659_v46  ;;  %vm151_vm3 = vweird.f32 %v661_v47 }
  0x89   :  { %455 = vrsqrt.f32 %v661_v47 }
  0x8a   :  { %v85_v48 = vpop.xlane.xlu2 %84  ;;  %v81_v49 = vpop.xlane.xlu1 %80 }
  0x8b   :  { %v118_v50 = vmul.f32 %v654_v38, %v85_v48  ;;  %v116_v51 = vmul.f32 %v654_v38, %v81_v49  ;;  %v77_v52 = vpop.xlane.xlu0 %76 }
  0x8c   :  { %v114_v53 = vmul.f32 %v654_v38, %v77_v52 }
  0x8d   :  { %v668_v54 = vpop.eup %451  ;;  %v670_v55 = vadd.f32 1e-05, %v118_v50  ;;  %v672_v56 = vadd.f32 1e-05, %v116_v51 }
  0x8e   :  { %v674_v57 = vpop.eup %453  ;;  %v186_v58 = vmul.f32 %v668_v54, %v133_v45  ;;  %v677_v59 = vadd.f32 1e-05, %v114_v53  ;;  %vm192_vm4 = vweird.f32 %v668_v54 }
  0x8f   :  { %v679_v60 = vpop.eup %455  ;;  %v166_v61 = vmul.f32 %v674_v57, %v659_v46  ;;  %457 = vrsqrt.f32 %v670_v55  ;;  %vm172_vm5 = vweird.f32 %v674_v57  ;;  %vm201_vm6 = vweird.f32 %v670_v55  ;;  %vm719_vm7 = vmor %vm191_vm1, %vm192_vm4 }
  0x90   :  { %v187_v62 = vmul.f32 %v668_v54, %v186_v58  ;;  %v146_v63 = vmul.f32 %v679_v60, %v661_v47  ;;  %459 = vrsqrt.f32 %v672_v56  ;;  %vm152_vm8 = vweird.f32 %v679_v60  ;;  %vm736_vm10 = vmor %vm171_vm2, %vm172_vm5 }
  0x91   :  { %v167_v3 = vmul.f32 %v674_v57, %v166_v61  ;;  %461 = vrsqrt.f32 %v677_v59  ;;  %vm181_vm9 = vweird.f32 %v672_v56  ;;  %vm161_vm13 = vweird.f32 %v677_v59  ;;  %vm750_vm14 = vmor %vm151_vm3, %vm152_vm8 }
  0x92   :  { %v188_v4 = vmul.f32 0.5, %v187_v62  ;;  %v147_v5 = vmul.f32 %v679_v60, %v146_v63  ;;  %v91_v9 = vpop.xlane.xlu2 %90  ;;  %v89_v10 = vpop.xlane.xlu1 %88 }
  0x93   :  { %v168_v11 = vmul.f32 0.5, %v167_v3  ;;  %v121_v15 = vmul.f32 %v654_v38, %v91_v9  ;;  %v87_v16 = vpop.xlane.xlu0 %86  ;;  %v120_v22 = vmul.f32 %v654_v38, %v89_v10  ;;  %v757_v3 = vld [vmem:[#allocation5] ss:$0 sm:$0xff] }
  0x94   :  { %v189_v17 = vsub.f32 1.5, %v188_v4  ;;  %v148_v21 = vmul.f32 0.5, %v147_v5  ;;  %v119_v44 = vmul.f32 %v654_v38, %v87_v16 }
  0x95   :  { %v693_v23 = vpop.eup %457  ;;  %v169_v27 = vsub.f32 1.5, %v168_v11  ;;  %v697_v28 = vadd.f32 1e-05, %v121_v15  ;;  %v716_v40 = vadd.f32 1e-05, %v120_v22 }
  0x96   :  { %v699_v29 = vpop.eup %459  ;;  %v190_v31 = vmul.f32 %v668_v54, %v189_v17  ;;  %v149_v32 = vsub.f32 1.5, %v148_v21  ;;  %v196_v33 = vmul.f32 %v693_v23, %v670_v55  ;;  %vm202_vm11 = vweird.f32 %v693_v23 }
  0x97   :  { %v705_v34 = vpop.eup %461  ;;  %v176_v35 = vmul.f32 %v699_v29, %v672_v56  ;;  %463 = vrsqrt.f32 %v697_v28  ;;  %v170_v36 = vmul.f32 %v674_v57, %v169_v27  ;;  %vm182_vm12 = vweird.f32 %v699_v29  ;;  %vm203_vm0 = vmor %vm201_vm6, %vm202_vm11 }
  0x98   :  { %v197_v37 = vmul.f32 %v693_v23, %v196_v33  ;;  %v156_v39 = vmul.f32 %v705_v34, %v677_v59  ;;  %v150_v42 = vmul.f32 %v679_v60, %v149_v32  ;;  %v194_v48 = vsel %vm719_vm7, %v668_v54, %v190_v31  ;;  %vm183_vm1 = vmor %vm181_vm9, %vm182_vm12 }
  0x99   :  { %v177_v43 = vmul.f32 %v699_v29, %v176_v35  ;;  %v174_v58 = vsel %vm736_vm10, %v674_v57, %v170_v36  ;;  %465 = vrsqrt.f32 %v716_v40  ;;  %v309_v4 = vmul.f32 %v194_v48, %v590_v0 }
  0x9a   :  { %v198_v49 = vmul.f32 0.5, %v197_v37  ;;  %v157_v45 = vmul.f32 %v705_v34, %v156_v39  ;;  %v97_v50 = vpop.xlane.xlu2 %96  ;;  %v95_v53 = vpop.xlane.xlu1 %94  ;;  %v154_v57 = vsel %vm750_vm14, %v679_v60, %v150_v42  ;;  %v763_v47 = vadd.f32 1e-05, %v119_v44 }
  0x9b   :  { %v178_v52 = vmul.f32 0.5, %v177_v43  ;;  %v93_v54 = vpop.xlane.xlu0 %92  ;;  %vm162_vm15 = vweird.f32 %v705_v34  ;;  %v307_v15 = vmul.f32 %v174_v58, %v592_v1  ;;  %v124_v60 = vmul.f32 %v654_v38, %v97_v50 }
  0x9c   :  { %v199_v61 = vsub.f32 1.5, %v198_v49  ;;  %v158_v62 = vmul.f32 0.5, %v157_v45  ;;  %467 = vrsqrt.f32 %v763_v47  ;;  %v305_v16 = vmul.f32 %v154_v57, %v594_v2  ;;  %vm163_vm2 = vmor %vm161_vm13, %vm162_vm15 }
  0x9d   :  { %v755_v63 = vpop.eup %463  ;;  %v179_v5 = vsub.f32 1.5, %v178_v52  ;;  %v123_v55 = vmul.f32 %v654_v38, %v95_v53  ;;  %v329_v21 = vmul.f32 %v757_v3, %v309_v4  ;;  %v792_v2 = vadd.f32 1e-05, %v124_v60 }
  0x9e   :  { %v200_v9 = vmul.f32 %v693_v23, %v199_v61  ;;  %v159_v10 = vsub.f32 1.5, %v158_v62  ;;  %v226_v11 = vmul.f32 %v755_v63, %v697_v28  ;;  %v122_v59 = vmul.f32 %v654_v38, %v93_v54 }
  0x9f   :  { %v180_v0 = vmul.f32 %v699_v29, %v179_v5  ;;  %v797_v33 = vadd.f32 1e-05, %v123_v55  ;;  %v327_v37 = vmul.f32 %v757_v3, %v307_v15  ;;  %v325_v39 = vmul.f32 %v757_v3, %v305_v16 }
  0xa0   :  { %v204_v17 = vsel %vm203_vm0, %v693_v23, %v200_v9  ;;  %v160_v1 = vmul.f32 %v705_v34, %v159_v10  ;;  %v466_v23 = vpop.eup %465  ;;  %v227_v32 = vmul.f32 %v755_v63, %v226_v11  ;;  %469 = vrsqrt.f32 %v792_v2 }
  0xa1   :  { %v310_v22 = vmul.f32 %v204_v17, %v602_v6  ;;  %v184_v27 = vsel %vm183_vm1, %v699_v29, %v180_v0  ;;  %v216_v35 = vmul.f32 %v466_v23, %v716_v40  ;;  %471 = vrsqrt.f32 %v797_v33 }
  0xa2   :  { %v308_v56 = vmul.f32 %v184_v27, %v604_v7  ;;  %v164_v31 = vsel %vm163_vm2, %v705_v34, %v160_v1  ;;  %v468_v34 = vpop.eup %467  ;;  %v101_v44 = vpop.xlane.xlu1 %100  ;;  %v228_v49 = vmul.f32 0.5, %v227_v32  ;;  %vm231_vm3 = vweird.f32 %v697_v28 }
  0xa3   :  { %v330_v6 = vmul.f32 %v757_v3, %v310_v22  ;;  %v306_v29 = vmul.f32 %v164_v31, %v606_v8  ;;  %v99_v36 = vpop.xlane.xlu0 %98  ;;  %v217_v43 = vmul.f32 %v466_v23, %v216_v35  ;;  %v103_v8 = vpop.xlane.xlu2 %102  ;;  %v206_v45 = vmul.f32 %v468_v34, %v763_v47 }
  0xa4   :  { %v328_v7 = vmul.f32 %v757_v3, %v308_v56  ;;  %v811_v52 = vadd.f32 1e-05, %v122_v59  ;;  %vm221_vm4 = vweird.f32 %v716_v40  ;;  %v127_v54 = vmul.f32 %v654_v38, %v103_v8 }
  0xa5   :  { %v406_v41 = vpack.c.bf16 %v330_v6, %v329_v21  ;;  %v326_v42 = vmul.f32 %v757_v3, %v306_v29  ;;  %v218_v51 = vmul.f32 0.5, %v217_v43  ;;  %v207_v53 = vmul.f32 %v468_v34, %v206_v45 }
  0xa6   :  { %v401_v48 = vpack.c.bf16 %v328_v7, %v327_v37  ;;  %v126_v58 = vmul.f32 %v654_v38, %v101_v44  ;;  %vm232_vm5 = vweird.f32 %v755_v63  ;;  %vm222_vm6 = vweird.f32 %v466_v23  ;;  %v470_v61 = vpop.eup %469 }
  0xa7   :  { %434 = vst [vmem:[#allocation7 + $0x10] sm:$0xff] %v406_v41   ;;  %v396_v50 = vpack.c.bf16 %v326_v42, %v325_v39  ;;  %v219_v46 = vsub.f32 1.5, %v218_v51  ;;  %473 = vrsqrt.f32 %v811_v52  ;;  %v229_v62 = vsub.f32 1.5, %v228_v49  ;;  %v472_v9 = vpop.eup %471  ;;  %vm223_vm8 = vmor %vm221_vm4, %vm222_vm6 }
  0xa8   :  { %433 = vst [vmem:[#allocation7 + $0x8] sm:$0xff] %v401_v48   ;;  %v208_v4 = vmul.f32 0.5, %v207_v53  ;;  %v818_v57 = vadd.f32 1e-05, %v127_v54  ;;  %v820_v5 = vadd.f32 1e-05, %v126_v58  ;;  %vm211_vm7 = vweird.f32 %v763_v47  ;;  %vm849_vm14 = vmor %vm231_vm3, %vm232_vm5 }
  0xa9   :  { %397 = vst [vmem:[#allocation7] sm:$0xff] %v396_v50   ;;  %v220_v10 = vmul.f32 %v466_v23, %v219_v46  ;;  %v256_v11 = vmul.f32 %v470_v61, %v792_v2  ;;  %v125_v15 = vmul.f32 %v654_v38, %v99_v36  ;;  %vm212_vm9 = vweird.f32 %v468_v34 }
  0xaa   :  { %v209_v0 = vsub.f32 1.5, %v208_v4  ;;  %v246_v60 = vmul.f32 %v472_v9, %v797_v33  ;;  %475 = vrsqrt.f32 %v818_v57  ;;  %vm261_vm10 = vweird.f32 %v792_v2  ;;  %vm213_vm11 = vmor %vm211_vm7, %vm212_vm9 }
  0xab   :  { %v105_v16 = vpop.xlane.xlu0 %104  ;;  %v224_v17 = vsel %vm223_vm8, %v466_v23, %v220_v10  ;;  %v257_v1 = vmul.f32 %v470_v61, %v256_v11  ;;  %477 = vrsqrt.f32 %v820_v5  ;;  %v230_v55 = vmul.f32 %v755_v63, %v229_v62 }
  0xac   :  { %v312_v21 = vmul.f32 %v224_v17, %v616_v13  ;;  %v210_v22 = vmul.f32 %v468_v34, %v209_v0  ;;  %v247_v40 = vmul.f32 %v472_v9, %v246_v60  ;;  %vm251_vm12 = vweird.f32 %v797_v33 }
  0xad   :  { %v474_v27 = vpop.eup %473  ;;  %v258_v56 = vmul.f32 0.5, %v257_v1  ;;  %v836_v31 = vadd.f32 1e-05, %v125_v15  ;;  %v128_v23 = vmul.f32 %v654_v38, %v105_v16  ;;  %vm262_vm13 = vweird.f32 %v470_v61 }
  0xae   :  { %v214_v32 = vsel %vm213_vm11, %v468_v34, %v210_v22  ;;  %v248_v6 = vmul.f32 0.5, %v247_v40  ;;  %v236_v29 = vmul.f32 %v474_v27, %v811_v52  ;;  %v332_v13 = vmul.f32 %v757_v3, %v312_v21  ;;  %vm263_vm0 = vmor %vm261_vm10, %vm262_vm13 }
  0xaf   :  { %v311_v35 = vmul.f32 %v214_v32, %v618_v14  ;;  %v259_v59 = vsub.f32 1.5, %v258_v56  ;;  %479 = vrsqrt.f32 %v836_v31  ;;  %vm252_vm15 = vweird.f32 %v472_v9 }
  0xb0   :  { %v843_v47 = vpop.eup %475  ;;  %v249_v36 = vsub.f32 1.5, %v248_v6  ;;  %v237_v37 = vmul.f32 %v474_v27, %v236_v29  ;;  %v853_v39 = vadd.f32 1e-05, %v128_v23  ;;  %v234_v14 = vsel %vm849_vm14, %v755_v63, %v230_v55  ;;  %vm253_vm2 = vmor %vm251_vm12, %vm252_vm15 }
  0xb1   :  { %v478_v7 = vpop.eup %477  ;;  %v331_v34 = vmul.f32 %v757_v3, %v311_v35  ;;  %v260_v41 = vmul.f32 %v470_v61, %v259_v59  ;;  %v286_v28 = vmul.f32 %v843_v47, %v818_v57  ;;  %vm242_vm1 = vweird.f32 %v474_v27 }
  0xb2   :  { %v250_v42 = vmul.f32 %v472_v9, %v249_v36  ;;  %v238_v43 = vmul.f32 0.5, %v237_v37  ;;  %v276_v8 = vmul.f32 %v478_v7, %v820_v5  ;;  %481 = vrsqrt.f32 %v853_v39 }
  0xb3   :  { %v411_v44 = vpack.c.bf16 %v332_v13, %v331_v34  ;;  %v264_v48 = vsel %vm263_vm0, %v470_v61, %v260_v41  ;;  %v287_v63 = vmul.f32 %v843_v47, %v286_v28  ;;  %v313_v53 = vmul.f32 %v234_v14, %v614_v12 }
  0xb4   :  { %v316_v49 = vmul.f32 %v264_v48, %v626_v18  ;;  %v254_v45 = vsel %vm253_vm2, %v472_v9, %v250_v42  ;;  %v239_v2 = vsub.f32 1.5, %v238_v43  ;;  %v277_v50 = vmul.f32 %v478_v7, %v276_v8 }
  0xb5   :  { %v480_v51 = vpop.eup %479  ;;  %435 = vst [vmem:[#allocation7 + $0x18] sm:$0xff] %v411_v44   ;;  %v315_v54 = vmul.f32 %v254_v45, %v628_v19  ;;  %vm241_vm3 = vweird.f32 %v811_v52  ;;  %v288_v58 = vmul.f32 0.5, %v287_v63  ;;  %vm281_vm5 = vweird.f32 %v820_v5 }
  0xb6   :  { %v336_v33 = vmul.f32 %v757_v3, %v316_v49  ;;  %v240_v46 = vmul.f32 %v474_v27, %v239_v2  ;;  %v278_v61 = vmul.f32 0.5, %v277_v50  ;;  %v266_v62 = vmul.f32 %v480_v51, %v836_v31  ;;  %vm243_vm4 = vmor %vm241_vm3, %vm242_vm1 }
  0xb7   :  { %v335_v18 = vmul.f32 %v757_v3, %v315_v54  ;;  %vm282_vm6 = vweird.f32 %v478_v7  ;;  %v289_v4 = vsub.f32 1.5, %v288_v58  ;;  %v333_v15 = vmul.f32 %v757_v3, %v313_v53 }
  0xb8   :  { %v244_v12 = vsel %vm243_vm4, %v474_v27, %v240_v46  ;;  %v279_v9 = vsub.f32 1.5, %v278_v61  ;;  %v267_v19 = vmul.f32 %v480_v51, %v266_v62  ;;  %v482_v10 = vpop.eup %481  ;;  %vm291_vm7 = vweird.f32 %v818_v57  ;;  %vm283_vm9 = vmor %vm281_vm5, %vm282_vm6 }
  0xb9   :  { %v421_v52 = vpack.c.bf16 %v336_v33, %v335_v18  ;;  %v314_v11 = vmul.f32 %v244_v12, %v630_v20  ;;  %v296_v16 = vmul.f32 %v482_v10, %v853_v39  ;;  %vm292_vm8 = vweird.f32 %v843_v47 }
  0xba   :  { %v280_v0 = vmul.f32 %v478_v7, %v279_v9  ;;  %v268_v60 = vmul.f32 0.5, %v267_v19  ;;  %vm272_vm10 = vweird.f32 %v480_v51  ;;  %v290_v20 = vmul.f32 %v843_v47, %v289_v4  ;;  %vm293_vm11 = vmor %vm291_vm7, %vm292_vm8 }
  0xbb   :  { %437 = vst [vmem:[#allocation7 + $0x28] sm:$0xff] %v421_v52   ;;  %v334_v17 = vmul.f32 %v757_v3, %v314_v11  ;;  %v297_v21 = vmul.f32 %v482_v10, %v296_v16  ;;  %vm271_vm12 = vweird.f32 %v836_v31  ;;  %vm302_vm14 = vweird.f32 %v482_v10 }
  0xbc   :  { %v284_v1 = vsel %vm283_vm9, %v478_v7, %v280_v0  ;;  %v269_v55 = vsub.f32 1.5, %v268_v60  ;;  %vm273_vm13 = vmor %vm271_vm12, %vm272_vm10  ;;  %v294_v56 = vsel %vm293_vm11, %v843_v47, %v290_v20  ;;  %vm301_vm15 = vweird.f32 %v853_v39 }
  0xbd   :  { %v416_v22 = vpack.c.bf16 %v334_v17, %v333_v15  ;;  %v318_v40 = vmul.f32 %v284_v1, %v640_v25  ;;  %v298_v57 = vmul.f32 0.5, %v297_v21  ;;  %v319_v25 = vmul.f32 %v294_v56, %v638_v24  ;;  %vm303_vm0 = vmor %vm301_vm15, %vm302_vm14 }
  0xbe   :  { %v270_v27 = vmul.f32 %v480_v51, %v269_v55 }
  0xbf   :  { %436 = vst [vmem:[#allocation7 + $0x20] sm:$0xff] %v416_v22   ;;  %v299_v23 = vsub.f32 1.5, %v298_v57  ;;  %v338_v32 = vmul.f32 %v757_v3, %v318_v40 }
  0xc0   :  { %v274_v5 = vsel %vm273_vm13, %v480_v51, %v270_v27 }
  0xc1   :  { %v317_v6 = vmul.f32 %v274_v5, %v642_v26  ;;  %v300_v29 = vmul.f32 %v482_v10, %v299_v23  ;;  %v339_v26 = vmul.f32 %v757_v3, %v319_v25 }
  0xc3   :  { %v337_v13 = vmul.f32 %v757_v3, %v317_v6  ;;  %v304_v31 = vsel %vm303_vm0, %v482_v10, %v300_v29 }
  0xc4   :  { %v320_v59 = vmul.f32 %v304_v31, %v650_v30 }
  0xc5   :  { %v426_v35 = vpack.c.bf16 %v338_v32, %v337_v13 }
  0xc6   :  { %v340_v47 = vmul.f32 %v757_v3, %v320_v59 }
  0xc7   :  { %438 = vst [vmem:[#allocation7 + $0x30] sm:$0xff] %v426_v35  }
  0xc8   :  { %v431_v24 = vpack.c.bf16 %v340_v47, %v339_v26 }
  0xca   :  { %439 = vst [vmem:[#allocation7 + $0x38] sm:$0xff] %v431_v24  }
  0xcb   :  { %385 = dma.vmem_to_hbm [thread:$0]  %s378_s1, 1024, %s380_s23, [#allocation4], %s567_s24, %s567_s24, %s568_s25  }
  0xcc   :  { %559 = dma.done.wait [#allocation4], 1024  }
  0xcd   :  { %560 = vsyncadd [#allocation4], 4294966272 }
  0xce   :  { %390 = vsyncpa [#allocation3], 1 }
  0xcf   :  { %391 = vsyncpa [#allocation6], 1 }
  0xd0   :  { %392 = vsyncpa [#allocation4], 1 }

</bundles_post_ra>
